<compile_context>
chip_gen: v5e
topology: v5e:2x2
jax: 0.10.0
libtpu: 0.0.40
codegen_flags: <defaults>
</compile_context>

<pallas_src>
import jax
import jax.numpy as jnp
from jax.experimental import pallas as pl
from jax.experimental.pallas import tpu as pltpu


def _round_up(x, m):
    return (x + m - 1) // m * m


def _mlp_kernel(x_ref, w1_ref, b1_ref, w2_ref, b2_ref, o_ref, acc_ref):
    k = pl.program_id(1)

    @pl.when(k == 0)
    def _():
        acc_ref[...] = jnp.zeros_like(acc_ref)

    # Partial hidden = x_tile @ W1_tile (bf16 operands, f32 MXU accumulation).
    acc_ref[...] += jnp.dot(x_ref[...], w1_ref[...],
                            preferred_element_type=jnp.float32)

    @pl.when(k == pl.num_programs(1) - 1)
    def _():
        h = jnp.maximum(acc_ref[...] + b1_ref[...], 0.0)   # bias + ReLU
        # Dropout(p=0.2) -> identity at inference time.
        out = jnp.dot(h.astype(jnp.bfloat16), w2_ref[...],
                      preferred_element_type=jnp.float32)
        o_ref[...] = (out + b2_ref[...]).astype(o_ref.dtype)


def baseline_alt_classifier(x, w1, b1, w2, b2, *, tm_cap=512,
                            w1_tile_budget_bytes=4 << 20):
    """x: [B, C, H, W] float32. w1: [in, hidden], w2: [hidden, classes].

    Returns logits [B, num_classes] float32.
    """
    B = x.shape[0]
    x_flat = x.reshape(B, -1)                   # Flatten (glue, plain JAX)
    input_size = x_flat.shape[1]
    hidden_size = w1.shape[1]
    num_classes = w2.shape[1]

    # Lane/sublane-friendly padded sizes.
    K128 = _round_up(input_size, 128)           # contraction dim of matmul 1
    Hp = _round_up(hidden_size, 128)            # hidden width (lane-dense)
    NC = _round_up(num_classes, 128)            # classifier width (lane-dense)

    # K tile: multiple of 128, sized so the double-buffered bf16 W1 tile
    # (TK, Hp) stays within a fixed VMEM budget even for large hidden sizes.
    TK = min(K128, max(128, (w1_tile_budget_bytes // (4 * Hp)) // 128 * 128))
    Kp = _round_up(K128, TK)

    # Batch tile: multiple of 8 sublanes, capped so double-buffered bf16 x
    # tiles + resident weights + f32 accumulator fit the 16 MiB default scoped
    # VMEM on v5e (and trivially on v6e/v7x).
    TM = min(tm_cap, _round_up(B, 8))
    Bp = _round_up(B, TM)

    # Zero-pad + cast activations/weights to bf16; biases stay f32.
    xb = jnp.zeros((Bp, Kp), jnp.bfloat16).at[:B, :input_size].set(
        x_flat.astype(jnp.bfloat16))
    w1b = jnp.zeros((Kp, Hp), jnp.bfloat16).at[:input_size, :hidden_size].set(
        w1.astype(jnp.bfloat16))
    b1p = jnp.zeros((1, Hp), jnp.float32).at[:, :hidden_size].set(
        b1.reshape(1, hidden_size).astype(jnp.float32))
    w2b = jnp.zeros((Hp, NC), jnp.bfloat16).at[:hidden_size, :num_classes].set(
        w2.astype(jnp.bfloat16))
    b2p = jnp.zeros((1, NC), jnp.float32).at[:, :num_classes].set(
        b2.reshape(1, num_classes).astype(jnp.float32))

    grid = (Bp // TM, Kp // TK)

    # Conservative per-step VMEM footprint (double-buffered inputs/outputs +
    # accumulator scratch), used for the scoped-VMEM limit hint.
    vmem_est = (2 * TM * TK * 2          # x tile (bf16)
                + 2 * TK * Hp * 2        # W1 tile (bf16)
                + 2 * Hp * NC * 2        # W2 (bf16, resident)
                + 2 * (Hp + NC) * 4      # biases (f32)
                + 2 * TM * NC * 4        # out tile (f32)
                + TM * Hp * 4)           # accumulator scratch (f32)
    vmem_limit = int(min(max(vmem_est * 3 // 2 + (1 << 20), 16 << 20), 48 << 20))

    cost = pl.CostEstimate(
        flops=2 * Bp * Kp * Hp + 2 * Bp * Hp * NC,
        transcendentals=0,
        bytes_accessed=(xb.size * 2 + w1b.size * 2 + w2b.size * 2
                        + b1p.size * 4 + b2p.size * 4 + Bp * NC * 4),
    )

    out = pl.pallas_call(
        _mlp_kernel,
        out_shape=jax.ShapeDtypeStruct((Bp, NC), jnp.float32),
        grid_spec=pltpu.PrefetchScalarGridSpec(
            num_scalar_prefetch=0,
            grid=grid,
            in_specs=[
                pl.BlockSpec((TM, TK), lambda i, k: (i, k)),   # x tile
                pl.BlockSpec((TK, Hp), lambda i, k: (k, 0)),   # W1 K-slab
                pl.BlockSpec((1, Hp), lambda i, k: (0, 0)),    # b1 resident
                pl.BlockSpec((Hp, NC), lambda i, k: (0, 0)),   # W2 resident
                pl.BlockSpec((1, NC), lambda i, k: (0, 0)),    # b2 resident
            ],
            out_specs=pl.BlockSpec((TM, NC), lambda i, k: (i, 0)),
            scratch_shapes=[pltpu.VMEM((TM, Hp), jnp.float32)],
        ),
        compiler_params=pltpu.CompilerParams(
            dimension_semantics=("parallel", "arbitrary"),
            vmem_limit_bytes=vmem_limit,
        ),
        cost_estimate=cost,
    )(xb, w1b, b1p, w2b, b2p)

    # Slice away batch padding and lane padding of the classifier width.
    return out[:B, :num_classes]


def _init_linear(key, fan_in, fan_out):
    """Deterministic init matching torch.nn.Linear's U(-1/sqrt(fan_in), 1/sqrt(fan_in))."""
    kw, kb = jax.random.split(key)
    bound = 1.0 / jnp.sqrt(jnp.float32(fan_in))
    # stored as [in, out] so the kernel does x @ W
    w = jax.random.uniform(kw, (fan_in, fan_out), jnp.float32, -bound, bound)
    b = jax.random.uniform(kb, (fan_out,), jnp.float32, -bound, bound)
    return w, b


if __name__ == "__main__":
    # Small shapes consistent with the module's forward:
    # x: [B=2, C=4, H=16, W=16] -> input_size = 4*16*16 = 1024
    B, C, H, W = 2, 4, 16, 16
    input_size = C * H * W
    hidden_size = 32
    num_classes = 10

    key = jax.random.PRNGKey(0)
    kx, k1, k2 = jax.random.split(key, 3)

    x = jax.random.normal(kx, (B, C, H, W), jnp.float32)
    w1, b1 = _init_linear(k1, input_size, hidden_size)
    w2, b2 = _init_linear(k2, hidden_size, num_classes)

    logits = baseline_alt_classifier(x, w1, b1, w2, b2)
    jax.block_until_ready(logits)
    assert logits.shape == (B, num_classes)

    # Reference check (eval-mode dropout == identity). Mirror the kernel's
    # bf16 input/weight precision so the comparison is tight.
    x_flat = x.reshape(B, -1)
    xb = x_flat.astype(jnp.bfloat16).astype(jnp.float32)
    w1b = w1.astype(jnp.bfloat16).astype(jnp.float32)
    w2b = w2.astype(jnp.bfloat16).astype(jnp.float32)
    hb = jnp.maximum(xb @ w1b + b1, 0.0)
    ref = hb.astype(jnp.bfloat16).astype(jnp.float32) @ w2b + b2
    assert jnp.allclose(logits, ref, atol=5e-2, rtol=5e-2)

    print("KERNEL_OK")
</pallas_src>

<mosaic_0001>
module attributes {stable_mosaic.version = 11 : i64} {
  func.func @_mlp_kernel(%arg0: i32, %arg1: i32, %arg2: memref<8x1024xbf16, #tpu.memory_space<vmem>>, %arg3: memref<1024x128xbf16, #tpu.memory_space<vmem>>, %arg4: memref<1x128xf32, #tpu.memory_space<vmem>>, %arg5: memref<128x128xbf16, #tpu.memory_space<vmem>>, %arg6: memref<1x128xf32, #tpu.memory_space<vmem>>, %arg7: memref<8x128xf32, #tpu.memory_space<vmem>>, %arg8: memref<8x128xf32, #tpu.memory_space<vmem>>) attributes {dimension_semantics = [#tpu.dimension_semantics<parallel>, #tpu.dimension_semantics<arbitrary>], iteration_bounds = array<i64: 1, 1>, scalar_prefetch = 0 : i64, scratch_operands = 1 : i64, tpu.core_type = #tpu.core_type<tc>, window_params = [{transform_indices = @transform_0, window_bounds = array<i64: 8, 1024>}, {transform_indices = @transform_1, window_bounds = array<i64: 1024, 128>}, {pipeline_mode = #tpu.pipeline_mode<synchronous>, transform_indices = @transform_2, window_bounds = array<i64: 1, 128>}, {pipeline_mode = #tpu.pipeline_mode<synchronous>, transform_indices = @transform_3, window_bounds = array<i64: 128, 128>}, {pipeline_mode = #tpu.pipeline_mode<synchronous>, transform_indices = @transform_4, window_bounds = array<i64: 1, 128>}, {transform_indices = @transform_5, window_bounds = array<i64: 8, 128>}]} {
    %c0_i32 = arith.constant 0 : i32
    %0 = arith.cmpi eq, %arg1, %c0_i32 : i32
    %1 = arith.extui %0 : i1 to i32
    %c0_i32_0 = arith.constant 0 : i32
    %2 = arith.cmpi ne, %1, %c0_i32_0 : i32
    scf.if %2 {
      %cst_10 = arith.constant 0.000000e+00 : f32
      %12 = vector.broadcast %cst_10 : f32 to vector<8x128xf32>
      %c0_11 = arith.constant 0 : index
      %c0_12 = arith.constant 0 : index
      %13 = vector.load %arg8[%c0_11, %c0_12] : memref<8x128xf32, #tpu.memory_space<vmem>>, vector<8x128xf32>
      tpu.vector_store %arg8[%c0_11, %c0_12], %12 {strides = array<i32>} : memref<8x128xf32, #tpu.memory_space<vmem>>, vector<8x128xf32>,
    } else {
    }
    %c0 = arith.constant 0 : index
    %c0_1 = arith.constant 0 : index
    %3 = vector.load %arg8[%c0, %c0_1] : memref<8x128xf32, #tpu.memory_space<vmem>>, vector<8x128xf32>
    %c0_2 = arith.constant 0 : index
    %c0_3 = arith.constant 0 : index
    %4 = vector.load %arg2[%c0_2, %c0_3] : memref<8x1024xbf16, #tpu.memory_space<vmem>>, vector<8x1024xbf16>
    %c0_4 = arith.constant 0 : index
    %c0_5 = arith.constant 0 : index
    %5 = vector.load %arg3[%c0_4, %c0_5] : memref<1024x128xbf16, #tpu.memory_space<vmem>>, vector<1024x128xbf16>
    %cst = arith.constant dense<0.000000e+00> : vector<8x128xf32>
    %6 = tpu.matmul %4, %5, %cst {dimension_numbers = #tpu.dot_dimension_numbers<[1], [0], [0], [1], [0, 0, 1, 1], [], []>} : vector<8x1024xbf16>, vector<1024x128xbf16>, vector<8x128xf32> -> vector<8x128xf32>
    %7 = arith.addf %3, %6 : vector<8x128xf32>
    %c0_6 = arith.constant 0 : index
    %c0_7 = arith.constant 0 : index
    %8 = vector.load %arg8[%c0_6, %c0_7] : memref<8x128xf32, #tpu.memory_space<vmem>>, vector<8x128xf32>
    tpu.vector_store %arg8[%c0_6, %c0_7], %7 {strides = array<i32>} : memref<8x128xf32, #tpu.memory_space<vmem>>, vector<8x128xf32>,
    %c0_i32_8 = arith.constant 0 : i32
    %9 = arith.cmpi eq, %arg1, %c0_i32_8 : i32
    %10 = arith.extui %9 : i1 to i32
    %c0_i32_9 = arith.constant 0 : i32
    %11 = arith.cmpi ne, %10, %c0_i32_9 : i32
    scf.if %11 {
      %c0_10 = arith.constant 0 : index
      %c0_11 = arith.constant 0 : index
      %12 = vector.load %arg8[%c0_10, %c0_11] : memref<8x128xf32, #tpu.memory_space<vmem>>, vector<8x128xf32>
      %c0_12 = arith.constant 0 : index
      %c0_13 = arith.constant 0 : index
      %13 = vector.load %arg4[%c0_12, %c0_13] : memref<1x128xf32, #tpu.memory_space<vmem>>, vector<1x128xf32>
      %14 = vector.broadcast %13 : vector<1x128xf32> to vector<8x128xf32>
      %15 = arith.addf %12, %14 : vector<8x128xf32>
      %cst_14 = arith.constant 0.000000e+00 : f32
      %16 = vector.broadcast %cst_14 : f32 to vector<8x128xf32>
      %17 = arith.maximumf %15, %16 : vector<8x128xf32>
      %18 = arith.truncf %17 : vector<8x128xf32> to vector<8x128xbf16>
      %c0_15 = arith.constant 0 : index
      %c0_16 = arith.constant 0 : index
      %19 = vector.load %arg5[%c0_15, %c0_16] : memref<128x128xbf16, #tpu.memory_space<vmem>>, vector<128x128xbf16>
      %cst_17 = arith.constant dense<0.000000e+00> : vector<8x128xf32>
      %20 = tpu.matmul %18, %19, %cst_17 {dimension_numbers = #tpu.dot_dimension_numbers<[1], [0], [0], [1], [0, 0, 1, 1], [], []>} : vector<8x128xbf16>, vector<128x128xbf16>, vector<8x128xf32> -> vector<8x128xf32>
      %c0_18 = arith.constant 0 : index
      %c0_19 = arith.constant 0 : index
      %21 = vector.load %arg6[%c0_18, %c0_19] : memref<1x128xf32, #tpu.memory_space<vmem>>, vector<1x128xf32>
      %22 = vector.broadcast %21 : vector<1x128xf32> to vector<8x128xf32>
      %23 = arith.addf %20, %22 : vector<8x128xf32>
      %c0_20 = arith.constant 0 : index
      %c0_21 = arith.constant 0 : index
      %24 = vector.load %arg7[%c0_20, %c0_21] : memref<8x128xf32, #tpu.memory_space<vmem>>, vector<8x128xf32>
      tpu.vector_store %arg7[%c0_20, %c0_21], %23 {strides = array<i32>} : memref<8x128xf32, #tpu.memory_space<vmem>>, vector<8x128xf32>,
    } else {
    }
    return
  }
  func.func @transform_0(%arg0: i32, %arg1: i32) -> (i32, i32) {
    %c0_i32 = arith.constant 0 : i32
    return %arg0, %arg1 : i32, i32
  }
  func.func @transform_1(%arg0: i32, %arg1: i32) -> (i32, i32) {
    %c0_i32 = arith.constant 0 : i32
    %c0_i32_0 = arith.constant 0 : i32
    return %arg1, %c0_i32 : i32, i32
  }
  func.func @transform_2(%arg0: i32, %arg1: i32) -> (i32, i32) {
    %c0_i32 = arith.constant 0 : i32
    %c0_i32_0 = arith.constant 0 : i32
    %c0_i32_1 = arith.constant 0 : i32
    return %c0_i32, %c0_i32_0 : i32, i32
  }
  func.func @transform_3(%arg0: i32, %arg1: i32) -> (i32, i32) {
    %c0_i32 = arith.constant 0 : i32
    %c0_i32_0 = arith.constant 0 : i32
    %c0_i32_1 = arith.constant 0 : i32
    return %c0_i32, %c0_i32_0 : i32, i32
  }
  func.func @transform_4(%arg0: i32, %arg1: i32) -> (i32, i32) {
    %c0_i32 = arith.constant 0 : i32
    %c0_i32_0 = arith.constant 0 : i32
    %c0_i32_1 = arith.constant 0 : i32
    return %c0_i32, %c0_i32_0 : i32, i32
  }
  func.func @transform_5(%arg0: i32, %arg1: i32) -> (i32, i32) {
    %c0_i32 = arith.constant 0 : i32
    %c0_i32_0 = arith.constant 0 : i32
    return %arg0, %c0_i32 : i32, i32
  }
}

</mosaic_0001>

<bundles_post_ra>
// kernel: tpu_custom_call.1
= control target key start
LH: loop header
LB: loop body
LE: loop exit
PB: predicated region body
PF: predicated region fallthrough
CT: control target
= control target key end

     0   :  { %10 = vsyncpa [#allocation4], 0  ;;  %s1357_s0 = inlined_call_operand.hbm [shape: bf16[8,1024], index: 0, kind: input, shape index: {}]   ;;  %s1358_s1 = inlined_call_operand.hbm [shape: bf16[1024,128], index: 1, kind: input, shape index: {}]   ;;  %s1359_s2 = inlined_call_operand.vmem [shape: f32[1,128], index: 2, kind: input, shape index: {}]   ;;  %s1360_s3 = inlined_call_operand.hbm [shape: bf16[128,128], index: 3, kind: input, shape index: {}]   ;;  %s1361_s4 = inlined_call_operand.vmem [shape: f32[1,128], index: 4, kind: input, shape index: {}]   ;;  %s1362_s5 = inlined_call_operand.hbm [shape: f32[8,128], index: 5, kind: output, shape index: {}]  }
   0x1   :  { %11 = vsyncpa [#allocation7], 0  ;;  %s28_s20 = sshll.u32 %s1358_s1, 4  ;;  %s29_s20 = int_to_ptr.hbm [resolvable:$true] %s28_s20 }
   0x2   :  { %12 = vsyncpa [#allocation5], 0  ;;  %s1303_s21 = smov [#allocation6]   ;;  %s18_s25 = sshll.u32 %s1357_s0, 4  ;;  %s19_s25 = int_to_ptr.hbm [resolvable:$true] %s18_s25 }
   0x3   :  { %s30_s22 = sshll.u32 %s1303_s21, 4  ;;  %s1304_s26 = smov 64   ;;  %s31_s22 = int_to_ptr.vmem [resolvable:$true] %s30_s22 }
   0x4   :  { %s1305_s27 = smov 4   ;;  %s1306_s28 = smov [#allocation3]  }
   0x5   :  { %36 = dma.hbm_to_vmem [thread:$0]  %s29_s20, 8192, %s31_s22, [#allocation7], %s1304_s26, %s1304_s26, %s1305_s27  }
   0x6   :  { %s20_s29 = sshll.u32 %s1306_s28, 4  ;;  %s43_s7 = sshll.u32 %s1360_s3, 4  ;;  %s21_s29 = int_to_ptr.vmem [resolvable:$true] %s20_s29  ;;  %s44_s7 = int_to_ptr.hbm [resolvable:$true] %s43_s7 }
   0x7   :  { %23 = dma.hbm_to_vmem [thread:$0]  %s19_s25, 512, %s21_s29, [#allocation4]  }
   0x8   :  { %s1307_s1 = smov [#allocation8]  }
   0x9   :  { %s45_s8 = sshll.u32 %s1307_s1, 4  ;;  %s46_s8 = int_to_ptr.vmem [resolvable:$true] %s45_s8 }
   0xa   :  { %51 = dma.hbm_to_vmem [thread:$0]  %s44_s7, 1024, %s46_s8, [#allocation7], %s1304_s26, %s1304_s26, %s1305_s27  }
   0xb   :  { %1297 = dma.done.wait [#allocation4], 512  }
   0xc   :  { %1298 = vsyncadd [#allocation4], 4294966784 }
   0xd   :  { %1299 = dma.done.wait [#allocation7], 9216  }
   0xe   :  { %1300 = vsyncadd [#allocation7], 4294958080  ;;  %v1128_v0 = vld [vmem:[#allocation6 + $0x38] sm:$0xff]  ;;  %v1127_v4 = vld [vmem:[#allocation6 + $0x30] sm:$0xff]  ;;  %s1308_s11 = smov [#allocation9]   ;;  %s822_s15 = sshll.u32 %s1362_s5, 4  ;;  %s823_s15 = int_to_ptr.hbm [resolvable:$true] %s822_s15 }
   0xf   :  { %v1136_v1 = vld [vmem:[#allocation6 + $0x78] sm:$0xff]  ;;  %616 = vmatpush.bf16.msra.mxu0 %v1128_v0  ;;  %v1135_v5 = vld [vmem:[#allocation6 + $0x70] sm:$0xff]  ;;  %v1126_v8 = vld [vmem:[#allocation6 + $0x28] sm:$0xff]  ;;  %s820_s12 = sshll.u32 %s1308_s11, 4  ;;  %s821_s12 = int_to_ptr.vmem [resolvable:$true] %s820_s12 }
  0x10   :  { %v1144_v2 = vld [vmem:[#allocation6 + $0xb8] sm:$0xff]  ;;  %629 = vmatpush.bf16.msra.mxu1 %v1136_v1  ;;  %v1143_v6 = vld [vmem:[#allocation6 + $0xb0] sm:$0xff]  ;;  %v1134_v9 = vld [vmem:[#allocation6 + $0x68] sm:$0xff] }
  0x11   :  { %v1152_v3 = vld [vmem:[#allocation6 + $0xf8] sm:$0xff]  ;;  %642 = vmatpush.bf16.msra.mxu2 %v1144_v2  ;;  %v1151_v7 = vld [vmem:[#allocation6 + $0xf0] sm:$0xff]  ;;  %v1142_v10 = vld [vmem:[#allocation6 + $0xa8] sm:$0xff] }
  0x12   :  { %655 = vmatpush.bf16.msra.mxu3 %v1152_v3  ;;  %v1150_v11 = vld [vmem:[#allocation6 + $0xe8] sm:$0xff]  ;;  %v1125_v12 = vld [vmem:[#allocation6 + $0x20] sm:$0xff]  ;;  %v1124_v16 = vld [vmem:[#allocation6 + $0x18] sm:$0xff] }
  0x13   :  { %617 = vmatpush.bf16.msra.mxu0 %v1127_v4  ;;  %v1133_v13 = vld [vmem:[#allocation6 + $0x60] sm:$0xff]  ;;  %v1132_v17 = vld [vmem:[#allocation6 + $0x58] sm:$0xff]  ;;  %v1123_v20 = vld [vmem:[#allocation6 + $0x10] sm:$0xff] }
  0x14   :  { %630 = vmatpush.bf16.msra.mxu1 %v1135_v5  ;;  %v1141_v14 = vld [vmem:[#allocation6 + $0xa0] sm:$0xff]  ;;  %v1140_v18 = vld [vmem:[#allocation6 + $0x98] sm:$0xff]  ;;  %v1131_v21 = vld [vmem:[#allocation6 + $0x50] sm:$0xff] }
  0x15   :  { %643 = vmatpush.bf16.msra.mxu2 %v1143_v6  ;;  %v1149_v15 = vld [vmem:[#allocation6 + $0xe0] sm:$0xff]  ;;  %v1148_v19 = vld [vmem:[#allocation6 + $0xd8] sm:$0xff]  ;;  %v1139_v22 = vld [vmem:[#allocation6 + $0x90] sm:$0xff] }
  0x16   :  { %656 = vmatpush.bf16.msra.mxu3 %v1151_v7  ;;  %v1147_v23 = vld [vmem:[#allocation6 + $0xd0] sm:$0xff]  ;;  %v1122_v24 = vld [vmem:[#allocation6 + $0x8] sm:$0xff]  ;;  %v72_v29 = vld [vmem:[#allocation3] sm:$0xff] }
  0x17   :  { %618 = vmatpush.bf16.msra.mxu0 %v1126_v8  ;;  %v1130_v25 = vld [vmem:[#allocation6 + $0x48] sm:$0xff]  ;;  %v1121_v30 = vld [vmem:[#allocation6] sm:$0xff]  ;;  %v208_v33 = vunpack.c.l.b16 %v72_v29  ;;  %v209_v37 = vunpack.c.h.b16 %v72_v29  ;;  %v1160_v38 = vld [vmem:[#allocation6 + $0x138] sm:$0xff] }
  0x18   :  { %631 = vmatpush.bf16.msra.mxu1 %v1134_v9  ;;  %v1138_v26 = vld [vmem:[#allocation6 + $0x88] sm:$0xff]  ;;  %v1129_v31 = vld [vmem:[#allocation6 + $0x40] sm:$0xff]  ;;  %v1168_v39 = vld [vmem:[#allocation6 + $0x178] sm:$0xff] }
  0x19   :  { %644 = vmatpush.bf16.msra.mxu2 %v1142_v10  ;;  %v1146_v27 = vld [vmem:[#allocation6 + $0xc8] sm:$0xff]  ;;  %v1137_v34 = vld [vmem:[#allocation6 + $0x80] sm:$0xff]  ;;  %v1176_v40 = vld [vmem:[#allocation6 + $0x1b8] sm:$0xff]  ;;  %v216_v43 = vpack.c.b16 %v208_v33, %v208_v33  ;;  %v217_v45 = vpack.c.b16 %v209_v37, %v209_v37 }
  0x1a   :  { %657 = vmatpush.bf16.msra.mxu3 %v1150_v11  ;;  %v73_v28 = vld [vmem:[#allocation3 + $0x8] sm:$0xff]  ;;  %v1145_v35 = vld [vmem:[#allocation6 + $0xc0] sm:$0xff]  ;;  %v1184_v41 = vld [vmem:[#allocation6 + $0x1f8] sm:$0xff] }
  0x1b   :  { %619 = vmatpush.bf16.msra.mxu0 %v1125_v12  ;;  %v210_v32 = vunpack.c.l.b16 %v73_v28  ;;  %v211_v36 = vunpack.c.h.b16 %v73_v28  ;;  %v1159_v46 = vld [vmem:[#allocation6 + $0x130] sm:$0xff]  ;;  %v1158_v50 = vld [vmem:[#allocation6 + $0x128] sm:$0xff]  ;;  %v1157_v54 = vld [vmem:[#allocation6 + $0x120] sm:$0xff] }
  0x1c   :  { %632 = vmatpush.bf16.msra.mxu1 %v1133_v13  ;;  %v1167_v47 = vld [vmem:[#allocation6 + $0x170] sm:$0xff]  ;;  %v1166_v51 = vld [vmem:[#allocation6 + $0x168] sm:$0xff]  ;;  %v1165_v55 = vld [vmem:[#allocation6 + $0x160] sm:$0xff] }
  0x1d   :  { %645 = vmatpush.bf16.msra.mxu2 %v1141_v14  ;;  %v218_v42 = vpack.c.b16 %v210_v32, %v210_v32  ;;  %v219_v44 = vpack.c.b16 %v211_v36, %v211_v36  ;;  %v1175_v48 = vld [vmem:[#allocation6 + $0x1b0] sm:$0xff]  ;;  %v1174_v52 = vld [vmem:[#allocation6 + $0x1a8] sm:$0xff]  ;;  %v1173_v56 = vld [vmem:[#allocation6 + $0x1a0] sm:$0xff] }
  0x1e   :  { %658 = vmatpush.bf16.msra.mxu3 %v1149_v15  ;;  %v1183_v49 = vld [vmem:[#allocation6 + $0x1f0] sm:$0xff]  ;;  %v1182_v53 = vld [vmem:[#allocation6 + $0x1e8] sm:$0xff]  ;;  %v1181_v57 = vld [vmem:[#allocation6 + $0x1e0] sm:$0xff] }
  0x1f   :  { %620 = vmatpush.bf16.msra.mxu0 %v1124_v16  ;;  %v1156_v58 = vld [vmem:[#allocation6 + $0x118] sm:$0xff]  ;;  %v1155_v62 = vld [vmem:[#allocation6 + $0x110] sm:$0xff]  ;;  %v1154_v2 = vld [vmem:[#allocation6 + $0x108] sm:$0xff] }
  0x20   :  { %633 = vmatpush.bf16.msra.mxu1 %v1132_v17  ;;  %v1164_v59 = vld [vmem:[#allocation6 + $0x158] sm:$0xff]  ;;  %v1163_v63 = vld [vmem:[#allocation6 + $0x150] sm:$0xff]  ;;  %v1162_v3 = vld [vmem:[#allocation6 + $0x148] sm:$0xff] }
  0x21   :  { %646 = vmatpush.bf16.msra.mxu2 %v1140_v18  ;;  %v1172_v60 = vld [vmem:[#allocation6 + $0x198] sm:$0xff]  ;;  %v1171_v0 = vld [vmem:[#allocation6 + $0x190] sm:$0xff]  ;;  %v1170_v5 = vld [vmem:[#allocation6 + $0x188] sm:$0xff] }
  0x22   :  { %659 = vmatpush.bf16.msra.mxu3 %v1148_v19  ;;  %v1180_v61 = vld [vmem:[#allocation6 + $0x1d8] sm:$0xff]  ;;  %v1179_v1 = vld [vmem:[#allocation6 + $0x1d0] sm:$0xff]  ;;  %v1178_v6 = vld [vmem:[#allocation6 + $0x1c8] sm:$0xff] }
  0x23   :  { %621 = vmatpush.bf16.msra.mxu0 %v1123_v20  ;;  %v74_v4 = vld [vmem:[#allocation3 + $0x10] sm:$0xff]  ;;  %v75_v7 = vld [vmem:[#allocation3 + $0x18] sm:$0xff]  ;;  %v1153_v10 = vld [vmem:[#allocation6 + $0x100] sm:$0xff] }
  0x24   :  { %634 = vmatpush.bf16.msra.mxu1 %v1131_v21  ;;  %v212_v8 = vunpack.c.l.b16 %v74_v4  ;;  %v213_v9 = vunpack.c.h.b16 %v74_v4  ;;  %v1161_v11 = vld [vmem:[#allocation6 + $0x140] sm:$0xff]  ;;  %v214_v12 = vunpack.c.l.b16 %v75_v7  ;;  %v215_v13 = vunpack.c.h.b16 %v75_v7  ;;  %v1192_v20 = vld [vmem:[#allocation8 + $0x38] sm:$0xff]  ;;  %v1191_v21 = vld [vmem:[#allocation8 + $0x30] sm:$0xff] }
  0x25   :  { %647 = vmatpush.bf16.msra.mxu2 %v1139_v22  ;;  %v1169_v14 = vld [vmem:[#allocation6 + $0x180] sm:$0xff]  ;;  %v1190_v22 = vld [vmem:[#allocation8 + $0x28] sm:$0xff] }
  0x26   :  { %660 = vmatpush.bf16.msra.mxu3 %v1147_v23  ;;  %v1177_v15 = vld [vmem:[#allocation6 + $0x1c0] sm:$0xff]  ;;  %v220_v16 = vpack.c.b16 %v212_v8, %v212_v8  ;;  %v221_v17 = vpack.c.b16 %v213_v9, %v213_v9  ;;  %v222_v18 = vpack.c.b16 %v214_v12, %v214_v12  ;;  %v223_v19 = vpack.c.b16 %v215_v13, %v215_v13  ;;  %v1186_v29 = vld [vmem:[#allocation8 + $0x8] sm:$0xff] }
  0x27   :  { %622 = vmatpush.bf16.msra.mxu0 %v1122_v24  ;;  %v1189_v23 = vld [vmem:[#allocation8 + $0x20] sm:$0xff]  ;;  %v1188_v24 = vld [vmem:[#allocation8 + $0x18] sm:$0xff] }
  0x28   :  { %635 = vmatpush.bf16.msra.mxu1 %v1130_v25  ;;  %v1185_v33 = vld [vmem:[#allocation8] sm:$0xff] }
  0x29   :  { %648 = vmatpush.bf16.msra.mxu2 %v1138_v26 }
  0x2a   :  { %661 = vmatpush.bf16.msra.mxu3 %v1146_v27  ;;  %v1187_v27 = vld [vmem:[#allocation8 + $0x10] sm:$0xff] }
  0x2b   :  { %623 = vmatpush.bf16.msra.mxu0 %v1121_v30 }
  0x2c   :  { %636 = vmatpush.bf16.msra.mxu1 %v1129_v31 }
  0x2d   :  { %649 = vmatpush.bf16.msra.mxu2 %v1137_v34 }
  0x2e   :  { %662 = vmatpush.bf16.msra.mxu3 %v1145_v35  ;;  %624 = vmatmul.bf16.vlgmr.msra.gmra.mxu0 %v216_v43 }
  0x2f   :  { %668 = vmatpush.bf16.msrb.mxu0 %v1160_v38  ;;  %637 = vmatmul.bf16.vlgmr.msra.gmra.mxu1 %v217_v45 }
  0x30   :  { %681 = vmatpush.bf16.msrb.mxu1 %v1168_v39  ;;  %650 = vmatmul.bf16.vlgmr.msra.gmra.mxu2 %v218_v42 }
  0x31   :  { %694 = vmatpush.bf16.msrb.mxu2 %v1176_v40  ;;  %663 = vmatmul.bf16.vlgmr.msra.gmra.mxu3 %v219_v44 }
  0x32   :  { %707 = vmatpush.bf16.msrb.mxu3 %v1184_v41 }
  0x33   :  { %669 = vmatpush.bf16.msrb.mxu0 %v1159_v46  ;;  %v1199_v46 = vld [vmem:[%s1359_s2] ss:$0 sm:$0xff] }
  0x34   :  { %682 = vmatpush.bf16.msrb.mxu1 %v1167_v47 }
  0x35   :  { %695 = vmatpush.bf16.msrb.mxu2 %v1175_v48 }
  0x36   :  { %708 = vmatpush.bf16.msrb.mxu3 %v1183_v49 }
  0x37   :  { %670 = vmatpush.bf16.msrb.mxu0 %v1158_v50 }
  0x38   :  { %683 = vmatpush.bf16.msrb.mxu1 %v1166_v51 }
  0x39   :  { %696 = vmatpush.bf16.msrb.mxu2 %v1174_v52 }
  0x3a   :  { %709 = vmatpush.bf16.msrb.mxu3 %v1182_v53 }
  0x3b   :  { %671 = vmatpush.bf16.msrb.mxu0 %v1157_v54 }
  0x3c   :  { %684 = vmatpush.bf16.msrb.mxu1 %v1165_v55  ;;  %v1200_v55 = vld [vmem:[%s1361_s4] ss:$0 sm:$0xff] }
  0x3d   :  { %697 = vmatpush.bf16.msrb.mxu2 %v1173_v56 }
  0x3e   :  { %710 = vmatpush.bf16.msrb.mxu3 %v1181_v57 }
  0x3f   :  { %672 = vmatpush.bf16.msrb.mxu0 %v1156_v58 }
  0x40   :  { %685 = vmatpush.bf16.msrb.mxu1 %v1164_v59 }
  0x41   :  { %698 = vmatpush.bf16.msrb.mxu2 %v1172_v60 }
  0x42   :  { %711 = vmatpush.bf16.msrb.mxu3 %v1180_v61 }
  0x43   :  { %673 = vmatpush.bf16.msrb.mxu0 %v1155_v62 }
  0x44   :  { %686 = vmatpush.bf16.msrb.mxu1 %v1163_v63 }
  0x45   :  { %699 = vmatpush.bf16.msrb.mxu2 %v1171_v0 }
  0x46   :  { %712 = vmatpush.bf16.msrb.mxu3 %v1179_v1 }
  0x47   :  { %674 = vmatpush.bf16.msrb.mxu0 %v1154_v2 }
  0x48   :  { %687 = vmatpush.bf16.msrb.mxu1 %v1162_v3 }
  0x49   :  { %700 = vmatpush.bf16.msrb.mxu2 %v1170_v5 }
  0x4a   :  { %713 = vmatpush.bf16.msrb.mxu3 %v1178_v6 }
  0x4b   :  { %675 = vmatpush.bf16.msrb.mxu0 %v1153_v10 }
  0x4c   :  { %688 = vmatpush.bf16.msrb.mxu1 %v1161_v11 }
  0x4d   :  { %701 = vmatpush.bf16.msrb.mxu2 %v1169_v14 }
  0x4e   :  { %714 = vmatpush.bf16.msrb.mxu3 %v1177_v15  ;;  %676 = vmatmul.bf16.vlgmr.msrb.gmra.mxu0 %v220_v16 }
  0x4f   :  { %689 = vmatmul.bf16.vlgmr.msrb.gmra.mxu1 %v221_v17  ;;  %801 = vmatpush.bf16.msra.mxu0 %v1192_v20 }
  0x50   :  { %702 = vmatmul.bf16.vlgmr.msrb.gmra.mxu2 %v222_v18 }
  0x51   :  { %715 = vmatmul.bf16.vlgmr.msrb.gmra.mxu3 %v223_v19 }
  0x53   :  { %802 = vmatpush.bf16.msra.mxu0 %v1191_v21 }
  0x57   :  { %803 = vmatpush.bf16.msra.mxu0 %v1190_v22 }
  0x5b   :  { %804 = vmatpush.bf16.msra.mxu0 %v1189_v23 }
  0x5f   :  { %805 = vmatpush.bf16.msra.mxu0 %v1188_v24 }
  0x63   :  { %806 = vmatpush.bf16.msra.mxu0 %v1187_v27 }
  0x67   :  { %807 = vmatpush.bf16.msra.mxu0 %v1186_v29 }
  0x6b   :  { %808 = vmatpush.bf16.msra.mxu0 %v1185_v33 }
  0xab   :  { %v625_v25 = vpop.f32.mrf.mxu0 }
  0xac   :  { %v638_v26 = vpop.f32.mrf.mxu1 }
  0xad   :  { %v639_v36 = vadd.f32 %v638_v26, %v625_v25 }
  0xb3   :  { %v651_v28 = vpop.f32.mrf.mxu2  ;;  %v627_v31 = vpop.f32.mrf.mxu0 }
  0xb4   :  { %v664_v30 = vpop.f32.mrf.mxu3  ;;  %v640_v32 = vpop.f32.mrf.mxu1  ;;  %v652_v37 = vadd.f32 %v651_v28, %v639_v36 }
  0xb6   :  { %v665_v38 = vadd.f32 %v664_v30, %v652_v37 }
  0xbb   :  { %v653_v34 = vpop.f32.mrf.mxu2 }
  0xbc   :  { %v666_v35 = vpop.f32.mrf.mxu3 }
  0xcb   :  { %v677_v39 = vpop.f32.mrf.mxu0 }
  0xcc   :  { %v690_v40 = vpop.f32.mrf.mxu1  ;;  %v678_v41 = vadd.f32 %v677_v39, %v665_v38 }
  0xce   :  { %v691_v42 = vadd.f32 %v690_v40, %v678_v41 }
  0xd3   :  { %v703_v43 = vpop.f32.mrf.mxu2  ;;  %v679_v47 = vpop.f32.mrf.mxu0 }
  0xd4   :  { %v716_v44 = vpop.f32.mrf.mxu3  ;;  %v704_v45 = vadd.f32 %v703_v43, %v691_v42  ;;  %v692_v48 = vpop.f32.mrf.mxu1 }
  0xd6   :  { %v717_v49 = vadd.f32 %v716_v44, %v704_v45 }
  0xd8   :  { %v730_v50 = vadd.f32 %v1199_v46, %v717_v49 }
  0xda   :  { %v731_v51 = vmax.f32 %v730_v50, 0.0 }
  0xdb   :  { %v705_v52 = vpop.f32.mrf.mxu2 }
  0xdc   :  { %v718_v53 = vpop.f32.mrf.mxu3  ;;  %v732_v54 = vpack.c.bf16 %v731_v51, %v731_v51 }
  0xde   :  { %809 = vmatmul.bf16.vlgmr.msra.gmra.mxu0 %v732_v54 }
 0x15b   :  { %v810_v56 = vpop.f32.mrf.mxu0 }
 0x15c   :  { %v811_v57 = vadd.f32 %v1200_v55, %v810_v56 }
 0x15e   :  { %814 = vst [vmem:[#allocation9] sm:$0xff] %v811_v57 }
 0x15f   :  { %825 = dma.vmem_to_hbm [thread:$0]  %s821_s12, 128, %s823_s15, [#allocation5]  }
 0x163   :  { %v812_v58 = vpop.f32.mrf.mxu0 }
 0x164   :  { %1301 = dma.done.wait [#allocation5], 128  }
 0x165   :  { %1302 = vsyncadd [#allocation5], 4294967168 }
 0x166   :  { %830 = vsyncpa [#allocation4], 1 }
 0x167   :  { %831 = vsyncpa [#allocation7], 1 }
 0x168   :  { %832 = vsyncpa [#allocation5], 1 }

</bundles_post_ra>
